<compile_context>
chip_gen: v5e
topology: v5e:2x2
jax: 0.10.0
libtpu: 0.0.40
codegen_flags: <defaults>
</compile_context>

<pallas_src>
import functools

import jax
import jax.numpy as jnp
from jax.experimental import pallas as pl
from jax.experimental.pallas import tpu as pltpu  # noqa: F401  (TPU backend)

IMG_SIZE = 16        # small stand-in for the real 120x120 SynergyNet input
C_IN = 3
C1 = 32              # conv-stem channels (stand-in for the mobilenet_v2 stem)
N_SHP = 40
N_EXP = 10
ALPHA_DIM = N_SHP + N_EXP     # 50 morphable-model coefficients
POSE_DIM = 12                 # 3x4 pose matrix
FC_PAD = 64                   # FC out lanes: [alpha 0:50 | pose 50:62 | pad 62:64]
N_VERT = 128         # small stand-in for the dense BFM vertex count
N_KEEP = 96          # |keep_ind|
TEX_RES = 32         # small stand-in for the 256x256 UV texture
K_IM2COL = 3 * 3 * C_IN       # 27
K_PAD = 128                   # im2col K padded to a full lane width
PIX_MEAN = 127.5
PIX_INV_STD = 1.0 / 128.0
ROI_EX = 256.0                # rect = [0, 0, 256, 256, 1.0]
ROI_EY = 256.0
SCALE_X = ROI_EX / IMG_SIZE
SCALE_Y = ROI_EY / IMG_SIZE
SCALE_Z = (SCALE_X + SCALE_Y) / 2.0


# ----------------------------- Pallas kernel -------------------------------

def _synergy_fused_kernel(patches_ref, wconv_ref, bconv_ref, wfc_ref, bfc_ref,
                          basis_ref, u_ref, verts_ref):
    """conv stem + ReLU6 + GAP + FC + dense verts + pose/roi transform."""
    # mobilenet_v2 stem conv (im2col matmul, Normalize folded into the weights
    # and bias at init) + ReLU6.  bf16 operands, f32 accumulation on the MXU.
    feat = jnp.dot(patches_ref[...], wconv_ref[...],
                   preferred_element_type=jnp.float32) + bconv_ref[...]
    feat = jnp.clip(feat, 0.0, 6.0)                          # (M, C1) f32

    # global average pool — sublane reduce, never leaves vregs / HBM.
    pooled = jnp.mean(feat, axis=0, keepdims=True)           # (1, C1)

    # FC head, output lanes = [alpha(50) | pose(12) | pad(2)].
    prm = jnp.dot(pooled.astype(jnp.bfloat16), wfc_ref[...],
                  preferred_element_type=jnp.float32) + bfc_ref[...]   # (1, 64)

    # dense-vertex reconstruction per axis (keep_ind-pruned, planar basis).
    # basis rows 50:64 are zero so the full 64-lane prm feeds the MXU directly.
    prm_b = prm.astype(jnp.bfloat16)
    vx = jnp.dot(prm_b, basis_ref[0],
                 preferred_element_type=jnp.float32) + u_ref[pl.ds(0, 1), :]
    vy = jnp.dot(prm_b, basis_ref[1],
                 preferred_element_type=jnp.float32) + u_ref[pl.ds(1, 1), :]
    vz = jnp.dot(prm_b, basis_ref[2],
                 preferred_element_type=jnp.float32) + u_ref[pl.ds(2, 1), :]

    # 12 pose scalars pulled from prm via lane-mask reduces, kept as (1,1) so
    # everything stays plain broadcast/reduce (no unsupported lane extraction).
    lane = jax.lax.broadcasted_iota(jnp.int32, (1, FC_PAD), 1)

    def pose(idx):
        return jnp.sum(jnp.where(lane == ALPHA_DIM + idx, prm, 0.0),
                       axis=1, keepdims=True)                # (1, 1) f32

    r00, r01, r02, t0 = pose(0), pose(1), pose(2), pose(3)
    r10, r11, r12, t1 = pose(4), pose(5), pose(6), pose(7)
    r20, r21, r22, t2 = pose(8), pose(9), pose(10), pose(11)

    # 3x4 pose transform + static roi_box rescale + vertical flip, fused.
    x = (r00 * vx + r01 * vy + r02 * vz + t0) * SCALE_X
    y = ROI_EY - (r10 * vx + r11 * vy + r12 * vz + t1) * SCALE_Y
    z = (r20 * vx + r21 * vy + r22 * vz + t2) * SCALE_Z
    verts_ref[...] = jnp.concatenate([x, y, z], axis=0)      # (3, N_KEEP)


def _run_fused(patches, params):
    """Single whole-array pallas_call; all operands are VMEM-resident."""
    return pl.pallas_call(
        _synergy_fused_kernel,
        out_shape=jax.ShapeDtypeStruct((3, N_KEEP), jnp.float32),
    )(patches, params["wconv"], params["bconv"], params["wfc"],
      params["bfc"], params["basis"], params["u"])


# --------------------------------- glue -------------------------------------

def _im2col_nhwc(img_hwc, kh, kw, stride, pad, pad_value):
    """HWC -> (Ho*Wo, kh*kw*C) patches; tap-major / channel-minor ordering."""
    H, W, C = img_hwc.shape
    xp = jnp.pad(img_hwc, ((pad, pad), (pad, pad), (0, 0)),
                 constant_values=pad_value)
    Ho = (H + 2 * pad - kh) // stride + 1
    Wo = (W + 2 * pad - kw) // stride + 1
    cols = []
    for i in range(kh):
        for j in range(kw):
            cols.append(xp[i:i + stride * Ho:stride,
                           j:j + stride * Wo:stride, :])
    patches = jnp.concatenate(cols, axis=-1)                 # (Ho, Wo, kh*kw*C)
    return patches.reshape(Ho * Wo, kh * kw * C)


def init_params(key, keep_ind, coord_u, coord_v):
    """Deterministic synthetic weights (stand-in for the .pth / .npy files),
    pre-packed once into the fused-kernel layouts."""
    ks = jax.random.split(key, 7)
    conv_w = jax.random.normal(ks[0], (C1, C_IN, 3, 3), jnp.float32) * 0.1
    conv_b = jax.random.normal(ks[1], (C1,), jnp.float32) * 0.01
    fc_w = jax.random.normal(ks[2], (C1, POSE_DIM + ALPHA_DIM), jnp.float32) * 0.1
    fc_b = jax.random.normal(ks[3], (POSE_DIM + ALPHA_DIM,), jnp.float32) * 0.01
    u_base = jax.random.normal(ks[4], (3 * N_VERT,), jnp.float32)
    w_shp = jax.random.normal(ks[5], (3 * N_VERT, N_SHP), jnp.float32) * 0.1
    w_exp = jax.random.normal(ks[6], (3 * N_VERT, N_EXP), jnp.float32) * 0.1

    # conv -> im2col layout, K order (kh, kw, c_in).  Normalize(127.5,128) is
    # folded: wconv' = w/128 (rounded to bf16), bconv' = b - 127.5*sum_k bf16(w/128)
    # so raw bf16 patches padded with exactly 127.5 reproduce the reference's
    # zero-padded conv on the normalized image exactly.
    wconv = conv_w.transpose(2, 3, 1, 0).reshape(K_IM2COL, C1)
    wconv = (wconv * PIX_INV_STD).astype(jnp.bfloat16)
    bconv = conv_b - PIX_MEAN * jnp.sum(wconv.astype(jnp.float32), axis=0)
    wconv_pad = jnp.zeros((K_PAD, C1), jnp.bfloat16).at[:K_IM2COL].set(wconv)

    # FC repacked to 64 output lanes: [alpha = shape(40)+exp(10) | pose(12) | 0].
    wfc = jnp.zeros((C1, FC_PAD), jnp.float32)
    wfc = wfc.at[:, :N_SHP].set(fc_w[:, POSE_DIM:POSE_DIM + N_SHP])
    wfc = wfc.at[:, N_SHP:ALPHA_DIM].set(fc_w[:, POSE_DIM + N_SHP:])
    wfc = wfc.at[:, ALPHA_DIM:ALPHA_DIM + POSE_DIM].set(fc_w[:, :POSE_DIM])
    bfc = jnp.zeros((1, FC_PAD), jnp.float32)
    bfc = bfc.at[0, :N_SHP].set(fc_b[POSE_DIM:POSE_DIM + N_SHP])
    bfc = bfc.at[0, N_SHP:ALPHA_DIM].set(fc_b[POSE_DIM + N_SHP:])
    bfc = bfc.at[0, ALPHA_DIM:ALPHA_DIM + POSE_DIM].set(fc_b[:POSE_DIM])

    # 3DMM basis / mean shape: keep_ind-pruned at init, planar (3, K, N_KEEP)
    # with K = 64 (rows 0:50 = [w_shp|w_exp], rows 50:64 zero for the pose lanes).
    # BFM flat order is xyz-interleaved per vertex (reshape(3,-1,order='F')).
    W = jnp.concatenate([w_shp, w_exp], axis=1)              # (3*N_VERT, 50)
    Wk = W.reshape(N_VERT, 3, ALPHA_DIM)[keep_ind]           # (N_KEEP, 3, 50)
    basis = jnp.zeros((3, FC_PAD, N_KEEP), jnp.float32)
    basis = basis.at[:, :ALPHA_DIM, :].set(jnp.transpose(Wk, (1, 2, 0)))
    u_kept = u_base.reshape(N_VERT, 3)[keep_ind].T           # (3, N_KEEP) f32

    # UV texture lookup: flip + (coord_u, coord_v) + keep_ind folded into one
    # flat gather index at init.
    cu = coord_u[keep_ind]
    cv = coord_v[keep_ind]
    uv_idx = ((TEX_RES - 1 - cu) * TEX_RES + cv).astype(jnp.int32)

    return {
        "wconv": wconv_pad,                        # (128, 32) bf16
        "bconv": bconv[None],                      # (1, 32)   f32
        "wfc": wfc.astype(jnp.bfloat16),           # (32, 64)  bf16
        "bfc": bfc,                                # (1, 64)   f32
        "basis": basis.astype(jnp.bfloat16),       # (3, 64, 96) bf16
        "u": u_kept,                               # (3, 96)   f32
        "uv_idx": uv_idx,                          # (96,)     i32
    }


def sy_net_forward(params, img_hwc, colors):
    # TODO(synk): crop_img + cv2.resize(INTER_LINEAR) have no clean Pallas
    # equivalent; the input is assumed to already be the IMG_SIZE crop.

    # im2col directly on the RAW HWC image in bf16 (exact for 0..255 / 127.5);
    # spatial pad = 127.5 so the folded bias correction cancels it exactly,
    # K 27->128 pad multiplies zero weight rows so it is plain zero.
    patches = _im2col_nhwc(img_hwc.astype(jnp.bfloat16), 3, 3, 2, 1,
                           pad_value=PIX_MEAN)               # (64, 27) bf16
    patches = jnp.pad(patches, ((0, 0), (0, K_PAD - K_IM2COL)))   # (64, 128)

    # ONE fused kernel: conv stem + ReLU6 + GAP + FC + dense vertices + pose
    # transform + static roi rescale / vertical flip  ->  (3, N_KEEP).
    verts = _run_fused(patches, params)

    # UV texture: single precomputed-index gather (flip/coord/keep folded at init).
    tex = colors.reshape(-1, 3)[params["uv_idx"]].astype(jnp.float32) / 255.0

    # TODO(synk): the Sim3DR mesh rasterizer `render(...)` and file I/O such as
    # cv2.imread / write_obj have no Pallas equivalent; we return the
    # transformed kept vertices and their per-vertex texture instead.
    return verts, tex


if __name__ == "__main__":
    key = jax.random.PRNGKey(0)
    k_img, k_par, k_col, k_keep, k_u, k_v = jax.random.split(key, 6)

    # init-time buffers (stand-ins for BFM_UV.npy / keptInd.npy)
    coord_u = jax.random.randint(k_u, (N_VERT,), 0, TEX_RES)
    coord_v = jax.random.randint(k_v, (N_VERT,), 0, TEX_RES)
    keep_ind = jnp.sort(jax.random.permutation(k_keep, N_VERT)[:N_KEEP])

    params = init_params(k_par, keep_ind, coord_u, coord_v)

    # uint8-valued synthetic face crop and UV color image
    img = jnp.floor(jax.random.uniform(k_img, (IMG_SIZE, IMG_SIZE, 3),
                                       minval=0.0, maxval=256.0))
    colors = jnp.floor(jax.random.uniform(k_col, (TEX_RES, TEX_RES, 3),
                                          minval=0.0, maxval=256.0))

    fwd = jax.jit(functools.partial(sy_net_forward, params))
    verts, tex = fwd(img, colors)
    jax.block_until_ready((verts, tex))

    assert verts.shape == (3, N_KEEP), verts.shape
    assert tex.shape == (N_KEEP, 3), tex.shape
    assert bool(jnp.all(jnp.isfinite(verts))) and bool(jnp.all(jnp.isfinite(tex)))
    print("KERNEL_OK")
</pallas_src>

<mosaic_0001>
module attributes {stable_mosaic.version = 11 : i64} {
  func.func @_synergy_fused_kernel(%arg0: memref<64x128xbf16, #tpu.memory_space<vmem>>, %arg1: memref<128x32xbf16, #tpu.memory_space<vmem>>, %arg2: memref<1x32xf32, #tpu.memory_space<vmem>>, %arg3: memref<32x64xbf16, #tpu.memory_space<vmem>>, %arg4: memref<1x64xf32, #tpu.memory_space<vmem>>, %arg5: memref<3x64x96xbf16, #tpu.memory_space<vmem>>, %arg6: memref<3x96xf32, #tpu.memory_space<vmem>>, %arg7: memref<3x96xf32, #tpu.memory_space<vmem>>) attributes {dimension_semantics = [], scalar_prefetch = 0 : i64, scratch_operands = 0 : i64, tpu.core_type = #tpu.core_type<tc>} {
    %c0 = arith.constant 0 : index
    %c0_0 = arith.constant 0 : index
    %0 = vector.load %arg0[%c0, %c0_0] : memref<64x128xbf16, #tpu.memory_space<vmem>>, vector<64x128xbf16>
    %c0_1 = arith.constant 0 : index
    %c0_2 = arith.constant 0 : index
    %1 = vector.load %arg1[%c0_1, %c0_2] : memref<128x32xbf16, #tpu.memory_space<vmem>>, vector<128x32xbf16>
    %cst = arith.constant dense<0.000000e+00> : vector<64x32xf32>
    %2 = tpu.matmul %0, %1, %cst {dimension_numbers = #tpu.dot_dimension_numbers<[1], [0], [0], [1], [0, 0, 1, 1], [], []>} : vector<64x128xbf16>, vector<128x32xbf16>, vector<64x32xf32> -> vector<64x32xf32>
    %c0_3 = arith.constant 0 : index
    %c0_4 = arith.constant 0 : index
    %3 = vector.load %arg2[%c0_3, %c0_4] : memref<1x32xf32, #tpu.memory_space<vmem>>, vector<1x32xf32>
    %4 = vector.broadcast %3 : vector<1x32xf32> to vector<64x32xf32>
    %5 = arith.addf %2, %4 : vector<64x32xf32>
    %cst_5 = arith.constant 0.000000e+00 : f32
    %cst_6 = arith.constant 6.000000e+00 : f32
    %6 = vector.broadcast %cst_5 : f32 to vector<64x32xf32>
    %7 = arith.maximumf %6, %5 : vector<64x32xf32>
    %8 = vector.broadcast %cst_6 : f32 to vector<64x32xf32>
    %9 = arith.minimumf %8, %7 : vector<64x32xf32>
    %cst_7 = arith.constant dense<0.000000e+00> : vector<32xf32>
    %10 = vector.multi_reduction <add>, %9, %cst_7 [0] : vector<64x32xf32> to vector<32xf32>
    %11 = vector.shape_cast %10 : vector<32xf32> to vector<1x32xf32>
    %cst_8 = arith.constant 6.400000e+01 : f32
    %12 = vector.broadcast %cst_8 : f32 to vector<1x32xf32>
    %13 = arith.divf %11, %12 : vector<1x32xf32>
    %14 = arith.truncf %13 : vector<1x32xf32> to vector<1x32xbf16>
    %c0_9 = arith.constant 0 : index
    %c0_10 = arith.constant 0 : index
    %15 = vector.load %arg3[%c0_9, %c0_10] : memref<32x64xbf16, #tpu.memory_space<vmem>>, vector<32x64xbf16>
    %cst_11 = arith.constant dense<0.000000e+00> : vector<1x64xf32>
    %16 = tpu.matmul %14, %15, %cst_11 {dimension_numbers = #tpu.dot_dimension_numbers<[1], [0], [0], [1], [0, 0, 1, 1], [], []>} : vector<1x32xbf16>, vector<32x64xbf16>, vector<1x64xf32> -> vector<1x64xf32>
    %c0_12 = arith.constant 0 : index
    %c0_13 = arith.constant 0 : index
    %17 = vector.load %arg4[%c0_12, %c0_13] : memref<1x64xf32, #tpu.memory_space<vmem>>, vector<1x64xf32>
    %18 = arith.addf %16, %17 : vector<1x64xf32>
    %19 = arith.truncf %18 : vector<1x64xf32> to vector<1x64xbf16>
    %c0_14 = arith.constant 0 : index
    %c0_15 = arith.constant 0 : index
    %c0_16 = arith.constant 0 : index
    %20 = vector.load %arg5[%c0_14, %c0_15, %c0_16] : memref<3x64x96xbf16, #tpu.memory_space<vmem>>, vector<1x64x96xbf16>
    %21 = vector.shape_cast %20 : vector<1x64x96xbf16> to vector<64x96xbf16>
    %cst_17 = arith.constant dense<0.000000e+00> : vector<1x96xf32>
    %22 = tpu.matmul %19, %21, %cst_17 {dimension_numbers = #tpu.dot_dimension_numbers<[1], [0], [0], [1], [0, 0, 1, 1], [], []>} : vector<1x64xbf16>, vector<64x96xbf16>, vector<1x96xf32> -> vector<1x96xf32>
    %c0_18 = arith.constant 0 : index
    %c0_19 = arith.constant 0 : index
    %23 = vector.load %arg6[%c0_18, %c0_19] : memref<3x96xf32, #tpu.memory_space<vmem>>, vector<1x96xf32>
    %24 = arith.addf %22, %23 : vector<1x96xf32>
    %c1 = arith.constant 1 : index
    %c0_20 = arith.constant 0 : index
    %c0_21 = arith.constant 0 : index
    %25 = vector.load %arg5[%c1, %c0_20, %c0_21] : memref<3x64x96xbf16, #tpu.memory_space<vmem>>, vector<1x64x96xbf16>
    %26 = vector.shape_cast %25 : vector<1x64x96xbf16> to vector<64x96xbf16>
    %cst_22 = arith.constant dense<0.000000e+00> : vector<1x96xf32>
    %27 = tpu.matmul %19, %26, %cst_22 {dimension_numbers = #tpu.dot_dimension_numbers<[1], [0], [0], [1], [0, 0, 1, 1], [], []>} : vector<1x64xbf16>, vector<64x96xbf16>, vector<1x96xf32> -> vector<1x96xf32>
    %c1_23 = arith.constant 1 : index
    %c0_24 = arith.constant 0 : index
    %28 = vector.load %arg6[%c1_23, %c0_24] : memref<3x96xf32, #tpu.memory_space<vmem>>, vector<1x96xf32>
    %29 = arith.addf %27, %28 : vector<1x96xf32>
    %c2 = arith.constant 2 : index
    %c0_25 = arith.constant 0 : index
    %c0_26 = arith.constant 0 : index
    %30 = vector.load %arg5[%c2, %c0_25, %c0_26] : memref<3x64x96xbf16, #tpu.memory_space<vmem>>, vector<1x64x96xbf16>
    %31 = vector.shape_cast %30 : vector<1x64x96xbf16> to vector<64x96xbf16>
    %cst_27 = arith.constant dense<0.000000e+00> : vector<1x96xf32>
    %32 = tpu.matmul %19, %31, %cst_27 {dimension_numbers = #tpu.dot_dimension_numbers<[1], [0], [0], [1], [0, 0, 1, 1], [], []>} : vector<1x64xbf16>, vector<64x96xbf16>, vector<1x96xf32> -> vector<1x96xf32>
    %c2_28 = arith.constant 2 : index
    %c0_29 = arith.constant 0 : index
    %33 = vector.load %arg6[%c2_28, %c0_29] : memref<3x96xf32, #tpu.memory_space<vmem>>, vector<1x96xf32>
    %34 = arith.addf %32, %33 : vector<1x96xf32>
    %35 = tpu.iota {dimensions = array<i32: 1>} : vector<1x64xi32>
    %c50_i32 = arith.constant 50 : i32
    %36 = vector.broadcast %c50_i32 : i32 to vector<1x64xi32>
    %37 = arith.cmpi eq, %35, %36 : vector<1x64xi32>
    %cst_30 = arith.constant 0.000000e+00 : f32
    %38 = vector.broadcast %cst_30 : f32 to vector<1x64xf32>
    %39 = arith.select %37, %18, %38 : vector<1x64xi1>, vector<1x64xf32>
    %cst_31 = arith.constant dense<0.000000e+00> : vector<1xf32>
    %40 = vector.multi_reduction <add>, %39, %cst_31 [1] : vector<1x64xf32> to vector<1xf32>
    %41 = vector.shape_cast %40 : vector<1xf32> to vector<1x1xf32>
    %c51_i32 = arith.constant 51 : i32
    %42 = vector.broadcast %c51_i32 : i32 to vector<1x64xi32>
    %43 = arith.cmpi eq, %35, %42 : vector<1x64xi32>
    %cst_32 = arith.constant 0.000000e+00 : f32
    %44 = vector.broadcast %cst_32 : f32 to vector<1x64xf32>
    %45 = arith.select %43, %18, %44 : vector<1x64xi1>, vector<1x64xf32>
    %cst_33 = arith.constant dense<0.000000e+00> : vector<1xf32>
    %46 = vector.multi_reduction <add>, %45, %cst_33 [1] : vector<1x64xf32> to vector<1xf32>
    %47 = vector.shape_cast %46 : vector<1xf32> to vector<1x1xf32>
    %c52_i32 = arith.constant 52 : i32
    %48 = vector.broadcast %c52_i32 : i32 to vector<1x64xi32>
    %49 = arith.cmpi eq, %35, %48 : vector<1x64xi32>
    %cst_34 = arith.constant 0.000000e+00 : f32
    %50 = vector.broadcast %cst_34 : f32 to vector<1x64xf32>
    %51 = arith.select %49, %18, %50 : vector<1x64xi1>, vector<1x64xf32>
    %cst_35 = arith.constant dense<0.000000e+00> : vector<1xf32>
    %52 = vector.multi_reduction <add>, %51, %cst_35 [1] : vector<1x64xf32> to vector<1xf32>
    %53 = vector.shape_cast %52 : vector<1xf32> to vector<1x1xf32>
    %c53_i32 = arith.constant 53 : i32
    %54 = vector.broadcast %c53_i32 : i32 to vector<1x64xi32>
    %55 = arith.cmpi eq, %35, %54 : vector<1x64xi32>
    %cst_36 = arith.constant 0.000000e+00 : f32
    %56 = vector.broadcast %cst_36 : f32 to vector<1x64xf32>
    %57 = arith.select %55, %18, %56 : vector<1x64xi1>, vector<1x64xf32>
    %cst_37 = arith.constant dense<0.000000e+00> : vector<1xf32>
    %58 = vector.multi_reduction <add>, %57, %cst_37 [1] : vector<1x64xf32> to vector<1xf32>
    %59 = vector.shape_cast %58 : vector<1xf32> to vector<1x1xf32>
    %c54_i32 = arith.constant 54 : i32
    %60 = vector.broadcast %c54_i32 : i32 to vector<1x64xi32>
    %61 = arith.cmpi eq, %35, %60 : vector<1x64xi32>
    %cst_38 = arith.constant 0.000000e+00 : f32
    %62 = vector.broadcast %cst_38 : f32 to vector<1x64xf32>
    %63 = arith.select %61, %18, %62 : vector<1x64xi1>, vector<1x64xf32>
    %cst_39 = arith.constant dense<0.000000e+00> : vector<1xf32>
    %64 = vector.multi_reduction <add>, %63, %cst_39 [1] : vector<1x64xf32> to vector<1xf32>
    %65 = vector.shape_cast %64 : vector<1xf32> to vector<1x1xf32>
    %c55_i32 = arith.constant 55 : i32
    %66 = vector.broadcast %c55_i32 : i32 to vector<1x64xi32>
    %67 = arith.cmpi eq, %35, %66 : vector<1x64xi32>
    %cst_40 = arith.constant 0.000000e+00 : f32
    %68 = vector.broadcast %cst_40 : f32 to vector<1x64xf32>
    %69 = arith.select %67, %18, %68 : vector<1x64xi1>, vector<1x64xf32>
    %cst_41 = arith.constant dense<0.000000e+00> : vector<1xf32>
    %70 = vector.multi_reduction <add>, %69, %cst_41 [1] : vector<1x64xf32> to vector<1xf32>
    %71 = vector.shape_cast %70 : vector<1xf32> to vector<1x1xf32>
    %c56_i32 = arith.constant 56 : i32
    %72 = vector.broadcast %c56_i32 : i32 to vector<1x64xi32>
    %73 = arith.cmpi eq, %35, %72 : vector<1x64xi32>
    %cst_42 = arith.constant 0.000000e+00 : f32
    %74 = vector.broadcast %cst_42 : f32 to vector<1x64xf32>
    %75 = arith.select %73, %18, %74 : vector<1x64xi1>, vector<1x64xf32>
    %cst_43 = arith.constant dense<0.000000e+00> : vector<1xf32>
    %76 = vector.multi_reduction <add>, %75, %cst_43 [1] : vector<1x64xf32> to vector<1xf32>
    %77 = vector.shape_cast %76 : vector<1xf32> to vector<1x1xf32>
    %c57_i32 = arith.constant 57 : i32
    %78 = vector.broadcast %c57_i32 : i32 to vector<1x64xi32>
    %79 = arith.cmpi eq, %35, %78 : vector<1x64xi32>
    %cst_44 = arith.constant 0.000000e+00 : f32
    %80 = vector.broadcast %cst_44 : f32 to vector<1x64xf32>
    %81 = arith.select %79, %18, %80 : vector<1x64xi1>, vector<1x64xf32>
    %cst_45 = arith.constant dense<0.000000e+00> : vector<1xf32>
    %82 = vector.multi_reduction <add>, %81, %cst_45 [1] : vector<1x64xf32> to vector<1xf32>
    %83 = vector.shape_cast %82 : vector<1xf32> to vector<1x1xf32>
    %c58_i32 = arith.constant 58 : i32
    %84 = vector.broadcast %c58_i32 : i32 to vector<1x64xi32>
    %85 = arith.cmpi eq, %35, %84 : vector<1x64xi32>
    %cst_46 = arith.constant 0.000000e+00 : f32
    %86 = vector.broadcast %cst_46 : f32 to vector<1x64xf32>
    %87 = arith.select %85, %18, %86 : vector<1x64xi1>, vector<1x64xf32>
    %cst_47 = arith.constant dense<0.000000e+00> : vector<1xf32>
    %88 = vector.multi_reduction <add>, %87, %cst_47 [1] : vector<1x64xf32> to vector<1xf32>
    %89 = vector.shape_cast %88 : vector<1xf32> to vector<1x1xf32>
    %c59_i32 = arith.constant 59 : i32
    %90 = vector.broadcast %c59_i32 : i32 to vector<1x64xi32>
    %91 = arith.cmpi eq, %35, %90 : vector<1x64xi32>
    %cst_48 = arith.constant 0.000000e+00 : f32
    %92 = vector.broadcast %cst_48 : f32 to vector<1x64xf32>
    %93 = arith.select %91, %18, %92 : vector<1x64xi1>, vector<1x64xf32>
    %cst_49 = arith.constant dense<0.000000e+00> : vector<1xf32>
    %94 = vector.multi_reduction <add>, %93, %cst_49 [1] : vector<1x64xf32> to vector<1xf32>
    %95 = vector.shape_cast %94 : vector<1xf32> to vector<1x1xf32>
    %c60_i32 = arith.constant 60 : i32
    %96 = vector.broadcast %c60_i32 : i32 to vector<1x64xi32>
    %97 = arith.cmpi eq, %35, %96 : vector<1x64xi32>
    %cst_50 = arith.constant 0.000000e+00 : f32
    %98 = vector.broadcast %cst_50 : f32 to vector<1x64xf32>
    %99 = arith.select %97, %18, %98 : vector<1x64xi1>, vector<1x64xf32>
    %cst_51 = arith.constant dense<0.000000e+00> : vector<1xf32>
    %100 = vector.multi_reduction <add>, %99, %cst_51 [1] : vector<1x64xf32> to vector<1xf32>
    %101 = vector.shape_cast %100 : vector<1xf32> to vector<1x1xf32>
    %c61_i32 = arith.constant 61 : i32
    %102 = vector.broadcast %c61_i32 : i32 to vector<1x64xi32>
    %103 = arith.cmpi eq, %35, %102 : vector<1x64xi32>
    %cst_52 = arith.constant 0.000000e+00 : f32
    %104 = vector.broadcast %cst_52 : f32 to vector<1x64xf32>
    %105 = arith.select %103, %18, %104 : vector<1x64xi1>, vector<1x64xf32>
    %cst_53 = arith.constant dense<0.000000e+00> : vector<1xf32>
    %106 = vector.multi_reduction <add>, %105, %cst_53 [1] : vector<1x64xf32> to vector<1xf32>
    %107 = vector.shape_cast %106 : vector<1xf32> to vector<1x1xf32>
    %108 = vector.broadcast %41 : vector<1x1xf32> to vector<1x96xf32>
    %109 = arith.mulf %108, %24 : vector<1x96xf32>
    %110 = vector.broadcast %47 : vector<1x1xf32> to vector<1x96xf32>
    %111 = arith.mulf %110, %29 : vector<1x96xf32>
    %112 = arith.addf %109, %111 : vector<1x96xf32>
    %113 = vector.broadcast %53 : vector<1x1xf32> to vector<1x96xf32>
    %114 = arith.mulf %113, %34 : vector<1x96xf32>
    %115 = arith.addf %112, %114 : vector<1x96xf32>
    %116 = vector.broadcast %59 : vector<1x1xf32> to vector<1x96xf32>
    %117 = arith.addf %115, %116 : vector<1x96xf32>
    %cst_54 = arith.constant 1.600000e+01 : f32
    %118 = vector.broadcast %cst_54 : f32 to vector<1x96xf32>
    %119 = arith.mulf %117, %118 : vector<1x96xf32>
    %120 = vector.broadcast %65 : vector<1x1xf32> to vector<1x96xf32>
    %121 = arith.mulf %120, %24 : vector<1x96xf32>
    %122 = vector.broadcast %71 : vector<1x1xf32> to vector<1x96xf32>
    %123 = arith.mulf %122, %29 : vector<1x96xf32>
    %124 = arith.addf %121, %123 : vector<1x96xf32>
    %125 = vector.broadcast %77 : vector<1x1xf32> to vector<1x96xf32>
    %126 = arith.mulf %125, %34 : vector<1x96xf32>
    %127 = arith.addf %124, %126 : vector<1x96xf32>
    %128 = vector.broadcast %83 : vector<1x1xf32> to vector<1x96xf32>
    %129 = arith.addf %127, %128 : vector<1x96xf32>
    %cst_55 = arith.constant 1.600000e+01 : f32
    %130 = vector.broadcast %cst_55 : f32 to vector<1x96xf32>
    %131 = arith.mulf %129, %130 : vector<1x96xf32>
    %cst_56 = arith.constant 2.560000e+02 : f32
    %132 = vector.broadcast %cst_56 : f32 to vector<1x96xf32>
    %133 = arith.subf %132, %131 : vector<1x96xf32>
    %134 = vector.broadcast %89 : vector<1x1xf32> to vector<1x96xf32>
    %135 = arith.mulf %134, %24 : vector<1x96xf32>
    %136 = vector.broadcast %95 : vector<1x1xf32> to vector<1x96xf32>
    %137 = arith.mulf %136, %29 : vector<1x96xf32>
    %138 = arith.addf %135, %137 : vector<1x96xf32>
    %139 = vector.broadcast %101 : vector<1x1xf32> to vector<1x96xf32>
    %140 = arith.mulf %139, %34 : vector<1x96xf32>
    %141 = arith.addf %138, %140 : vector<1x96xf32>
    %142 = vector.broadcast %107 : vector<1x1xf32> to vector<1x96xf32>
    %143 = arith.addf %141, %142 : vector<1x96xf32>
    %cst_57 = arith.constant 1.600000e+01 : f32
    %144 = vector.broadcast %cst_57 : f32 to vector<1x96xf32>
    %145 = arith.mulf %143, %144 : vector<1x96xf32>
    %146 = tpu.concatenate %119, %133, %145 in 0 : vector<1x96xf32>, vector<1x96xf32>, vector<1x96xf32> -> vector<3x96xf32>
    %c0_58 = arith.constant 0 : index
    %c0_59 = arith.constant 0 : index
    %147 = vector.load %arg7[%c0_58, %c0_59] : memref<3x96xf32, #tpu.memory_space<vmem>>, vector<3x96xf32>
    tpu.vector_store %arg7[%c0_58, %c0_59], %146 {strides = array<i32>} : memref<3x96xf32, #tpu.memory_space<vmem>>, vector<3x96xf32>,
    return
  }
}

</mosaic_0001>

<bundles_post_ra>
// kernel: sy_net_forward.1
= control target key start
LH: loop header
LB: loop body
LE: loop exit
PB: predicated region body
PF: predicated region fallthrough
CT: control target
= control target key end

     0   :  { %s851_s0 = inlined_call_operand.vmem [shape: bf16[64,128], index: 0, kind: input, shape index: {}]   ;;  %s852_s1 = inlined_call_operand.vmem [shape: bf16[128,32], index: 1, kind: input, shape index: {}]   ;;  %s853_s2 = inlined_call_operand.vmem [shape: f32[1,32], index: 2, kind: input, shape index: {}]   ;;  %s854_s3 = inlined_call_operand.vmem [shape: bf16[32,64], index: 3, kind: input, shape index: {}]   ;;  %s855_s4 = inlined_call_operand.vmem [shape: f32[1,64], index: 4, kind: input, shape index: {}]   ;;  %s856_s5 = inlined_call_operand.vmem [shape: bf16[3,64,96], index: 5, kind: input, shape index: {}]   ;;  %s857_s6 = inlined_call_operand.vmem [shape: f32[3,96], index: 6, kind: input, shape index: {}]   ;;  %s858_s7 = inlined_call_operand.hbm [shape: f32[3,96], index: 7, kind: output, shape index: {}]  }
   0x1   :  { %v630_v0 = vld [vmem:[%s852_s1 + $0x38] sm:$0xff]  ;;  %v629_v1 = vld [vmem:[%s852_s1 + $0x30] sm:$0xff] }
   0x2   :  { %128 = vmatpush.bf16.msra.mxu0 %v630_v0  ;;  %645 = vmatpush.bf16.msra.mxu2 %v630_v0 }
   0x3   :  { %646 = vmatpush.bf16.msra.mxu3 %v630_v0 }
   0x4   :  { %12 = vsyncpa [#allocation3], 0  ;;  %v628_v2 = vld [vmem:[%s852_s1 + $0x28] sm:$0xff]  ;;  %v627_v3 = vld [vmem:[%s852_s1 + $0x20] sm:$0xff]  ;;  %vm173_vm0 = vcmask 261120   ;;  %v692_v39 = vmov 64.0  }
   0x5   :  { %v626_v4 = vld [vmem:[%s852_s1 + $0x18] sm:$0xff]  ;;  %v625_v5 = vld [vmem:[%s852_s1 + $0x10] sm:$0xff]  ;;  %v624_v6 = vld [vmem:[%s852_s1 + $0x8] sm:$0xff]  ;;  %664 = vrcp.f32 %v692_v39  ;;  %vm386_vm5 = vcmask 516096   ;;  %vm271_vm6 = vcmask 523264   ;;  %s486_s10 = sshll.u32 %s858_s7, 4  ;;  %s487_s10 = int_to_ptr.hbm [resolvable:$true] %s486_s10 }
   0x6   :  { %129 = vmatpush.bf16.msra.mxu0 %v629_v1  ;;  %647 = vmatpush.bf16.msra.mxu2 %v629_v1  ;;  %v623_v7 = vld [vmem:[%s852_s1] sm:$0xff]  ;;  %v621_v9 = vld [vmem:[%s851_s0 + $0x10] sm:$0xff]  ;;  %v622_v10 = vld [vmem:[%s851_s0 + $0x18] sm:$0xff] }
   0x7   :  { %648 = vmatpush.bf16.msra.mxu3 %v629_v1  ;;  %v619_v8 = vld [vmem:[%s851_s0] sm:$0xff]  ;;  %v620_v11 = vld [vmem:[%s851_s0 + $0x8] sm:$0xff]  ;;  %v636_v40 = vld [vmem:[%s856_s5 + $0x18] sm:$0xff] }
   0x8   :  { %v663_v14 = vld [vmem:[%s853_s2] ss:$0 sm:$0xff]  ;;  %v632_v19 = vld [vmem:[%s854_s3 + $0x8] sm:$0xff]  ;;  %v640_v41 = vld [vmem:[%s856_s5 + $0x38] sm:$0xff] }
   0x9   :  { %230 = vmatpush.bf16.msra.mxu1 %v632_v19  ;;  %v631_v21 = vld [vmem:[%s854_s3] sm:$0xff]  ;;  %v644_v42 = vld [vmem:[%s856_s5 + $0x58] sm:$0xff]  ;;  %v635_v48 = vld [vmem:[%s856_s5 + $0x10] sm:$0xff] }
   0xa   :  { %130 = vmatpush.bf16.msra.mxu0 %v628_v2  ;;  %649 = vmatpush.bf16.msra.mxu2 %v628_v2  ;;  %v639_v49 = vld [vmem:[%s856_s5 + $0x30] sm:$0xff]  ;;  %v634_v60 = vld [vmem:[%s856_s5 + $0x8] sm:$0xff] }
   0xb   :  { %650 = vmatpush.bf16.msra.mxu3 %v628_v2  ;;  %v643_v53 = vld [vmem:[%s856_s5 + $0x50] sm:$0xff]  ;;  %v665_v58 = vpop.eup %664  ;;  %v638_v61 = vld [vmem:[%s856_s5 + $0x28] sm:$0xff] }
   0xc   :  { %v642_v0 = vld [vmem:[%s856_s5 + $0x48] sm:$0xff]  ;;  %vm200_vm1 = vweird.f32 %v665_v58 }
   0xd   :  { %231 = vmatpush.bf16.msra.mxu1 %v631_v21 }
   0xe   :  { %131 = vmatpush.bf16.msra.mxu0 %v627_v3  ;;  %651 = vmatpush.bf16.msra.mxu2 %v627_v3 }
   0xf   :  { %652 = vmatpush.bf16.msra.mxu3 %v627_v3 }
  0x11   :  { %373 = vmatpush.bf16.msrb.mxu1 %v644_v42 }
  0x12   :  { %132 = vmatpush.bf16.msra.mxu0 %v626_v4  ;;  %653 = vmatpush.bf16.msra.mxu2 %v626_v4 }
  0x13   :  { %654 = vmatpush.bf16.msra.mxu3 %v626_v4  ;;  %v196_v4 = vmul.f32 64.0, %v665_v58 }
  0x15   :  { %374 = vmatpush.bf16.msrb.mxu1 %v643_v53 }
  0x16   :  { %133 = vmatpush.bf16.msra.mxu0 %v625_v5  ;;  %655 = vmatpush.bf16.msra.mxu2 %v625_v5 }
  0x17   :  { %656 = vmatpush.bf16.msra.mxu3 %v625_v5 }
  0x19   :  { %375 = vmatpush.bf16.msrb.mxu1 %v642_v0  ;;  %v246_v0 = vld [vmem:[%s857_s6] sm:$0x1] }
  0x1a   :  { %134 = vmatpush.bf16.msra.mxu0 %v624_v6  ;;  %657 = vmatpush.bf16.msra.mxu2 %v624_v6 }
  0x1b   :  { %658 = vmatpush.bf16.msra.mxu3 %v624_v6 }
  0x1e   :  { %135 = vmatpush.bf16.msra.mxu0 %v623_v7  ;;  %659 = vmatpush.bf16.msra.mxu2 %v623_v7 }
  0x1f   :  { %660 = vmatpush.bf16.msra.mxu3 %v623_v7 }
  0x21   :  { %136 = vmatmul.bf16.vlgmr.msra.gmra.mxu0 %v619_v8  ;;  %146 = vmatmul.bf16.vlgmr.msra.gmra.mxu2 %v621_v9  ;;  %v197_v9 = vsub.f32 1.0, %v196_v4 }
  0x22   :  { %151 = vmatmul.bf16.vlgmr.msra.gmra.mxu3 %v622_v10  ;;  %279 = vmatpush.bf16.msrb.mxu2 %v636_v40 }
  0x23   :  { %326 = vmatpush.bf16.msrb.mxu3 %v640_v41 }
  0x26   :  { %280 = vmatpush.bf16.msrb.mxu2 %v635_v48 }
  0x27   :  { %327 = vmatpush.bf16.msrb.mxu3 %v639_v49 }
  0x2a   :  { %281 = vmatpush.bf16.msrb.mxu2 %v634_v60 }
  0x2b   :  { %328 = vmatpush.bf16.msrb.mxu3 %v638_v61 }
  0x31   :  { %141 = vmatmul.bf16.gmra.mxu0 %v620_v11 }
  0x9e   :  { %v137_v12 = vpop.f32.mrf.mxu0 }
  0x9f   :  { %v138_v17 = vadd.f32 %v663_v14, %v137_v12  ;;  %v198_v12 = vmul.f32 %v665_v58, %v197_v9 }
  0xa1   :  { %v157_v24 = vmax.f32 %v138_v17, 0.0 }
  0xa3   :  { %v165_v29 = vmin.f32 %v157_v24, 6.0  ;;  %v641_v24 = vld [vmem:[%s856_s5 + $0x40] sm:$0xff] }
  0xa4   :  { %v147_v15 = vpop.f32.mrf.mxu2  ;;  %376 = vmatpush.bf16.msrb.mxu1 %v641_v24 }
  0xa5   :  { %v152_v18 = vpop.f32.mrf.mxu3  ;;  %v148_v28 = vadd.f32 %v663_v14, %v147_v15  ;;  %v174_v38 = vsel %vm173_vm0, %v165_v29, 0.0  ;;  %v199_v15 = vadd.f32 %v665_v58, %v198_v12 }
  0xa6   :  { %v139_v13 = vpop.f32.mrf.mxu0  ;;  %v153_v36 = vadd.f32 %v663_v14, %v152_v18 }
  0xa7   :  { %v140_v16 = vadd.f32 %v663_v14, %v139_v13  ;;  %v161_v35 = vmax.f32 %v148_v28, 0.0  ;;  %v201_v18 = vsel %vm200_vm1, %v665_v58, %v199_v15  ;;  %vm475_vm1 = vcmask 1041408  }
  0xa8   :  { %v163_v51 = vmax.f32 %v153_v36, 0.0 }
  0xa9   :  { %v158_v22 = vmax.f32 %v140_v16, 0.0  ;;  %v169_v50 = vmin.f32 %v161_v35, 6.0 }
  0xaa   :  { %v171_v63 = vmin.f32 %v163_v51, 6.0 }
  0xab   :  { %v166_v27 = vmin.f32 %v158_v22, 6.0  ;;  %v181_v62 = vsel %vm173_vm0, %v169_v50, 0.0  ;;  %v633_v22 = vld [vmem:[%s856_s5] sm:$0xff] }
  0xac   :  { %v149_v26 = vpop.f32.mrf.mxu2  ;;  %v185_v6 = vsel %vm173_vm0, %v171_v63, 0.0  ;;  %282 = vmatpush.bf16.msrb.mxu2 %v633_v22  ;;  %v344_v63 = vld [vmem:[%s857_s6 + $0x2] sm:$0x1] }
  0xad   :  { %v150_v31 = vadd.f32 %v663_v14, %v149_v26  ;;  %v154_v33 = vpop.f32.mrf.mxu3  ;;  %v175_v34 = vsel %vm173_vm0, %v166_v27, 0.0  ;;  %v208_v27 = vld [vmem:[%s855_s4] sm:$0x1] }
  0xae   :  { %v142_v20 = vpop.f32.mrf.mxu0  ;;  %v155_v46 = vadd.f32 %v663_v14, %v154_v33  ;;  %v176_v47 = vadd.f32 %v175_v34, %v174_v38 }
  0xaf   :  { %v143_v23 = vadd.f32 %v663_v14, %v142_v20  ;;  %v162_v44 = vmax.f32 %v150_v31, 0.0 }
  0xb0   :  { %v164_v57 = vmax.f32 %v155_v46, 0.0 }
  0xb1   :  { %v159_v25 = vmax.f32 %v143_v23, 0.0  ;;  %v170_v55 = vmin.f32 %v162_v44, 6.0  ;;  %v637_v23 = vld [vmem:[%s856_s5 + $0x20] sm:$0xff] }
  0xb2   :  { %v172_v3 = vmin.f32 %v164_v57, 6.0  ;;  %329 = vmatpush.bf16.msrb.mxu3 %v637_v23 }
  0xb3   :  { %v167_v30 = vmin.f32 %v159_v25, 6.0  ;;  %v183_v2 = vsel %vm173_vm0, %v170_v55, 0.0  ;;  %v382_v25 = vlaneseq }
  0xb4   :  { %v187_v8 = vsel %vm173_vm0, %v172_v3, 0.0  ;;  %v297_v3 = vld [vmem:[%s857_s6 + $0x1] sm:$0x1]  ;;  %s693_s6 = smov [#allocation2]  }
  0xb5   :  { %v177_v43 = vsel %vm173_vm0, %v167_v30, 0.0  ;;  %v383_v26 = vand.u32 127, %v382_v25  ;;  %s484_s30 = sshll.u32 %s693_s6, 4  ;;  %s485_s30 = int_to_ptr.vmem [resolvable:$true] %s484_s30 }
  0xb6   :  { %v144_v32 = vpop.f32.mrf.mxu0  ;;  %v178_v54 = vadd.f32 %v177_v43, %v176_v47 }
  0xb7   :  { %v145_v37 = vadd.f32 %v663_v14, %v144_v32  ;;  %vm430_vm2 = vcmp.eq.s32.totalorder %v383_v26, 59  ;;  %vm415_vm3 = vcmp.eq.s32.totalorder %v383_v26, 56  ;;  %vm405_vm4 = vcmp.eq.s32.totalorder %v383_v26, 54 }
  0xb8   :  { %vm425_vm7 = vcmp.eq.s32.totalorder %v383_v26, 58  ;;  %vm384_vm8 = vcmp.eq.s32.totalorder %v383_v26, 50  ;;  %vm410_vm9 = vcmp.eq.s32.totalorder %v383_v26, 55  ;;  %vm435_vm10 = vcmp.eq.s32.totalorder %v383_v26, 60 }
  0xb9   :  { %v160_v45 = vmax.f32 %v145_v37, 0.0  ;;  %vm395_vm11 = vcmp.eq.s32.totalorder %v383_v26, 52  ;;  %vm390_vm12 = vcmp.eq.s32.totalorder %v383_v26, 51  ;;  %vm440_vm13 = vcmp.eq.s32.totalorder %v383_v26, 61 }
  0xba   :  { %vm400_vm14 = vcmp.eq.s32.totalorder %v383_v26, 53  ;;  %vm420_vm15 = vcmp.eq.s32.totalorder %v383_v26, 57 }
  0xbb   :  { %v168_v52 = vmin.f32 %v160_v45, 6.0 }
  0xbd   :  { %v179_v56 = vsel %vm173_vm0, %v168_v52, 0.0 }
  0xbe   :  { %v180_v59 = vadd.f32 %v179_v56, %v178_v54 }
  0xc0   :  { %v182_v1 = vadd.f32 %v181_v62, %v180_v59 }
  0xc2   :  { %v184_v5 = vadd.f32 %v183_v2, %v182_v1 }
  0xc4   :  { %v186_v7 = vadd.f32 %v185_v6, %v184_v5 }
  0xc6   :  { %v188_v10 = vadd.f32 %v187_v8, %v186_v7 }
  0xc8   :  { %v189_v11 = vrot.slane %v188_v10, 4 }
  0xca   :  { %v190_v13 = vadd.f32 %v189_v11, %v188_v10 }
  0xcc   :  { %v191_v14 = vrot.slane %v190_v13, 2 }
  0xce   :  { %v192_v16 = vadd.f32 %v191_v14, %v190_v13 }
  0xd0   :  { %v193_v17 = vrot.slane %v192_v16, 1 }
  0xd2   :  { %v194_v19 = vadd.f32 %v193_v17, %v192_v16 }
  0xd4   :  { %v202_v20 = vmul.f32 %v201_v18, %v194_v19 }
  0xd6   :  { %v203_v21 = vpack.c.bf16 %v202_v20, %v202_v20 }
  0xd8   :  { %551 = vmatmul.msk.bf16.vlgmr.msra.gmra.mxu1 %vm173_vm0, %v203_v21  ;;  %vm473_vm0 = vcmask 1040384  }
 0x155   :  { %v233_v28 = vpop.f32.mrf.mxu1 }
 0x156   :  { %v234_v29 = vadd.f32 %v233_v28, %v208_v27 }
 0x158   :  { %v431_v30 = vsel %vm430_vm2, %v234_v29, 0.0  ;;  %v416_v31 = vsel %vm415_vm3, %v234_v29, 0.0  ;;  %v406_v32 = vsel %vm405_vm4, %v234_v29, 0.0  ;;  %v237_v33 = vpack.c.bf16 %v234_v29, %v234_v29 }
 0x159   :  { %v432_v34 = vsel %vm386_vm5, %v431_v30, 0.0  ;;  %v417_v35 = vsel %vm386_vm5, %v416_v31, 0.0  ;;  %v407_v36 = vsel %vm386_vm5, %v406_v32, 0.0  ;;  %v426_v38 = vsel %vm425_vm7, %v234_v29, 0.0 }
 0x15a   :  { %433 = vadd.xlane.f32.xlu2 %v432_v34  ;;  %418 = vadd.xlane.f32.xlu1 %v417_v35  ;;  %v385_v39 = vsel %vm384_vm8, %v234_v29, 0.0  ;;  %v411_v40 = vsel %vm410_vm9, %v234_v29, 0.0  ;;  %v427_v41 = vsel %vm386_vm5, %v426_v38, 0.0  ;;  %v436_v44 = vsel %vm435_vm10, %v234_v29, 0.0 }
 0x15b   :  { %408 = vadd.xlane.f32.xlu0 %v407_v36  ;;  %568 = vmatmul.msk.bf16.vlgmr.msrb.gmra.mxu2 %vm271_vm6, %v237_v33  ;;  %v387_v42 = vsel %vm386_vm5, %v385_v39, 0.0  ;;  %v412_v43 = vsel %vm386_vm5, %v411_v40, 0.0  ;;  %v396_v45 = vsel %vm395_vm11, %v234_v29, 0.0  ;;  %v391_v46 = vsel %vm390_vm12, %v234_v29, 0.0 }
 0x15c   :  { %593 = vmatmul.msk.bf16.vlgmr.msrb.gmra.mxu3 %vm271_vm6, %v237_v33  ;;  %618 = vmatmul.msk.bf16.vlgmr.msrb.gmra.mxu1 %vm271_vm6, %v237_v33  ;;  %v437_v47 = vsel %vm386_vm5, %v436_v44, 0.0  ;;  %v397_v48 = vsel %vm386_vm5, %v396_v45, 0.0  ;;  %v392_v49 = vsel %vm386_vm5, %v391_v46, 0.0  ;;  %v441_v50 = vsel %vm440_vm13, %v234_v29, 0.0 }
 0x15d   :  { %v235_v37 = vpop.f32.mrf.mxu1  ;;  %v401_v51 = vsel %vm400_vm14, %v234_v29, 0.0  ;;  %v421_v52 = vsel %vm420_vm15, %v234_v29, 0.0  ;;  %v442_v53 = vsel %vm386_vm5, %v441_v50, 0.0  ;;  %vm477_vm2 = vcmask 780288  }
 0x15e   :  { %v402_v54 = vsel %vm386_vm5, %v401_v51, 0.0  ;;  %v422_v55 = vsel %vm386_vm5, %v421_v52, 0.0 }
 0x162   :  { %428 = vadd.xlane.f32.xlu1 %v427_v41  ;;  %388 = vadd.xlane.f32.xlu2 %v387_v42 }
 0x163   :  { %413 = vadd.xlane.f32.xlu0 %v412_v43 }
 0x16a   :  { %438 = vadd.xlane.f32.xlu1 %v437_v47  ;;  %398 = vadd.xlane.f32.xlu2 %v397_v48 }
 0x16b   :  { %393 = vadd.xlane.f32.xlu0 %v392_v49 }
 0x172   :  { %443 = vadd.xlane.f32.xlu1 %v442_v53  ;;  %403 = vadd.xlane.f32.xlu2 %v402_v54 }
 0x173   :  { %423 = vadd.xlane.f32.xlu0 %v422_v55 }
 0x1cd   :  { %v434_v56 = vpop.xlane.xlu2 %433  ;;  %v419_v57 = vpop.xlane.xlu1 %418 }
 0x1ce   :  { %v409_v58 = vpop.xlane.xlu0 %408 }
 0x1d5   :  { %v429_v59 = vpop.xlane.xlu1 %428  ;;  %v389_v60 = vpop.xlane.xlu2 %388 }
 0x1d6   :  { %v414_v61 = vpop.xlane.xlu0 %413 }
 0x1d9   :  { %v378_v62 = vpop.f32.mrf.mxu1 }
 0x1da   :  { %v379_v6 = vadd.f32 %v378_v62, %v344_v63 }
 0x1dc   :  { %v455_v18 = vmul.f32 %v419_v57, %v379_v6 }
 0x1dd   :  { %v439_v1 = vpop.xlane.xlu1 %438  ;;  %v399_v2 = vpop.xlane.xlu2 %398 }
 0x1de   :  { %v394_v4 = vpop.xlane.xlu0 %393  ;;  %v284_v5 = vpop.f32.mrf.mxu2  ;;  %v463_v17 = vmul.f32 %v439_v1, %v379_v6  ;;  %v448_v19 = vmul.f32 %v399_v2, %v379_v6 }
 0x1df   :  { %v285_v7 = vadd.f32 %v284_v5, %v246_v0  ;;  %v331_v8 = vpop.f32.mrf.mxu3 }
 0x1e0   :  { %v332_v9 = vadd.f32 %v331_v8, %v297_v3 }
 0x1e1   :  { %v445_v10 = vmul.f32 %v389_v60, %v285_v7  ;;  %v452_v11 = vmul.f32 %v409_v58, %v285_v7  ;;  %v460_v12 = vmul.f32 %v429_v59, %v285_v7  ;;  %v380_v13 = vpop.f32.mrf.mxu1 }
 0x1e2   :  { %v446_v14 = vmul.f32 %v394_v4, %v332_v9  ;;  %v453_v15 = vmul.f32 %v414_v61, %v332_v9  ;;  %v461_v16 = vmul.f32 %v434_v56, %v332_v9 }
 0x1e4   :  { %v462_v20 = vadd.f32 %v461_v16, %v460_v12  ;;  %v454_v21 = vadd.f32 %v453_v15, %v452_v11  ;;  %v447_v22 = vadd.f32 %v446_v14, %v445_v10 }
 0x1e5   :  { %v444_v23 = vpop.xlane.xlu1 %443  ;;  %v404_v29 = vpop.xlane.xlu2 %403 }
 0x1e6   :  { %v464_v24 = vadd.f32 %v463_v17, %v462_v20  ;;  %v424_v25 = vpop.xlane.xlu0 %423  ;;  %v456_v26 = vadd.f32 %v455_v18, %v454_v21  ;;  %v449_v27 = vadd.f32 %v448_v19, %v447_v22  ;;  %v286_v28 = vpop.f32.mrf.mxu2 }
 0x1e7   :  { %v333_v30 = vpop.f32.mrf.mxu3 }
 0x1e8   :  { %v465_v31 = vadd.f32 %v464_v24, %v444_v23  ;;  %v457_v32 = vadd.f32 %v456_v26, %v424_v25  ;;  %v450_v34 = vadd.f32 %v449_v27, %v404_v29 }
 0x1ea   :  { %v458_v33 = vmul.f32 16.0, %v457_v32  ;;  %v466_v35 = vmul.f32 16.0, %v465_v31  ;;  %v451_v38 = vmul.f32 16.0, %v450_v34 }
 0x1ec   :  { %v459_v36 = vsub.f32 256.0, %v458_v33  ;;  %v471_v39 = vrot.slane %v466_v35, 6 }
 0x1ee   :  { %v468_v37 = vrot.slane %v459_v36, 7 }
 0x1f0   :  { %v474_v40 = vsel %vm473_vm0, %v451_v38, %v468_v37 }
 0x1f1   :  { %v476_v41 = vsel %vm475_vm1, %v474_v40, %v471_v39 }
 0x1f2   :  { %478 = vst.msk [vmem:[#allocation2] sm:$0x7] %vm477_vm2, %v476_v41 }
 0x1f3   :  { %489 = dma.vmem_to_hbm [thread:$0]  %s485_s30, 64, %s487_s10, [#allocation3]  }
 0x1f4   :  { %690 = dma.done.wait [#allocation3], 64  }
 0x1f5   :  { %691 = vsyncadd [#allocation3], 4294967232 }
 0x1f6   :  { %494 = vsyncpa [#allocation3], 1 }

</bundles_post_ra>
